<compile_context>
chip_gen: v6e
topology: v6e:2x2x1
jax: 0.10.0
libtpu: 0.0.40
codegen_flags: <defaults>
</compile_context>

<pallas_src>
import jax
import jax.numpy as jnp
from jax.experimental import pallas as pl
from jax.experimental.pallas import tpu as pltpu


def _round_up(a, b):
    return ((a + b - 1) // b) * b


def node_model_kernel(
    x_ref, ea_ref, col_ref, row_ref,
    w1ax_ref, w1ae_ref, b1a_ref, w1b_ref, b1b_ref,
    w2ax_ref, w2ah_ref, b2a_ref, w2b_ref, b2b_ref,
    out_ref,
    acc_ref, cnt_ref,
):
    e_step = pl.program_id(0)

    @pl.when(e_step == 0)
    def _():
        acc_ref[...] = jnp.zeros_like(acc_ref)
        cnt_ref[...] = jnp.zeros_like(cnt_ref)

    N = x_ref.shape[0]
    tE = ea_ref.shape[0]

    x = x_ref[...]            # [N, Fx]
    ea = ea_ref[...]          # [tE, Fe]
    col = col_ref[...]        # [tE, 1] int32 (padded edges hold N -> zero one-hot)
    row = row_ref[...]        # [1, tE] int32 (padded edges hold N -> zero one-hot)

    # --- gather fused into node_mlp_1's first Linear -------------------------
    # p = x @ W1a_x is tiny ([N,H]); oh_col @ p == (x[col]) @ W1a_x.
    p = jnp.dot(x, w1ax_ref[...], preferred_element_type=jnp.float32)      # [N, H]
    iota_en = jax.lax.broadcasted_iota(jnp.int32, (tE, N), 1)
    oh_col = (col == iota_en).astype(jnp.float32)                          # [tE, N]

    h = (jnp.dot(oh_col, p, preferred_element_type=jnp.float32)
         + jnp.dot(ea, w1ae_ref[...], preferred_element_type=jnp.float32)
         + b1a_ref[...])
    h = jnp.maximum(h, 0.0)
    h = jnp.dot(h, w1b_ref[...], preferred_element_type=jnp.float32) + b1b_ref[...]  # [tE, H]

    # --- scatter(sum,count) with pre-transposed one-hot ----------------------
    iota_ne = jax.lax.broadcasted_iota(jnp.int32, (N, tE), 0)
    oh_row_t = (iota_ne == row).astype(jnp.float32)                        # [N, tE]
    acc_ref[...] += jnp.dot(oh_row_t, h, preferred_element_type=jnp.float32)   # [N, H]
    cnt_ref[...] += jnp.sum(oh_row_t, axis=-1, keepdims=True)                  # [N, 1] (XLU)

    # --- finalize: mean, node_mlp_2, store ------------------------------------
    @pl.when(e_step == pl.num_programs(0) - 1)
    def _():
        mean = acc_ref[...] * pl.reciprocal(jnp.maximum(cnt_ref[...], 1.0),
                                            approx=False)                  # [N, H]
        g = (jnp.dot(x, w2ax_ref[...], preferred_element_type=jnp.float32)
             + jnp.dot(mean, w2ah_ref[...], preferred_element_type=jnp.float32)
             + b2a_ref[...])
        g = jnp.maximum(g, 0.0)
        out = jnp.dot(g, w2b_ref[...], preferred_element_type=jnp.float32) + b2b_ref[...]
        out_ref[...] = out.astype(out_ref.dtype)


def node_model_pallas(x, edge_index, edge_attr, params, *, tile_e=512):
    N, Fx = x.shape
    E, Fe = edge_attr.shape
    (w1a, b1a, w1b, b1b, w2a, b2a, w2b, b2b) = params
    H = w1a.shape[1]

    # Edge tiling: lane-aligned tile (multiple of 128), E padded up to a tile multiple.
    # (Halve tile_e when targeting v7x's 64 MiB VMEM at very large N.)
    tE = _round_up(min(tile_e, _round_up(E, 128)), 128)
    E_pad = _round_up(E, tE)
    pad = E_pad - E

    row = edge_index[0].astype(jnp.int32)
    col = edge_index[1].astype(jnp.int32)
    # Pad with index N (out of range) => one-hot rows/cols are all zero => no contribution.
    row_p = jnp.concatenate([row, jnp.full((pad,), N, jnp.int32)]).reshape(1, E_pad)
    col_p = jnp.concatenate([col, jnp.full((pad,), N, jnp.int32)]).reshape(E_pad, 1)
    ea_p = jnp.concatenate(
        [edge_attr.astype(jnp.float32), jnp.zeros((pad, Fe), jnp.float32)], axis=0)

    # Split the concat-facing weights in glue code (no in-kernel odd-row slicing).
    w1ax, w1ae = w1a[:Fx, :], w1a[Fx:, :]
    w2ax, w2ah = w2a[:Fx, :], w2a[Fx:, :]

    def const2d(shape):
        return pl.BlockSpec(shape, lambda e: (0, 0))

    grid = (E_pad // tE,)
    grid_spec = pltpu.PrefetchScalarGridSpec(
        num_scalar_prefetch=0,
        grid=grid,
        in_specs=[
            const2d((N, Fx)),                                # x (resident)
            pl.BlockSpec((tE, Fe), lambda e: (e, 0)),        # edge_attr tile
            pl.BlockSpec((tE, 1), lambda e: (e, 0)),         # col tile
            pl.BlockSpec((1, tE), lambda e: (0, e)),         # row tile (pre-transposed)
            const2d((Fx, H)), const2d((Fe, H)), const2d((1, H)),
            const2d((H, H)), const2d((1, H)),
            const2d((Fx, H)), const2d((H, H)), const2d((1, H)),
            const2d((H, Fx)), const2d((1, Fx)),
        ],
        out_specs=pl.BlockSpec((N, Fx), lambda e: (0, 0)),   # resident across E axis
        scratch_shapes=[
            pltpu.VMEM((N, H), jnp.float32),                 # segment-sum accumulator
            pltpu.VMEM((N, 1), jnp.float32),                 # segment counts
        ],
    )

    return pl.pallas_call(
        node_model_kernel,
        out_shape=jax.ShapeDtypeStruct((N, Fx), jnp.float32),
        grid_spec=grid_spec,
        compiler_params=pltpu.CompilerParams(
            dimension_semantics=("arbitrary",)),             # E axis is a reduction
    )(
        x.astype(jnp.float32), ea_p, col_p, row_p,
        w1ax, w1ae, b1a.reshape(1, H), w1b, b1b.reshape(1, H),
        w2ax, w2ah, b2a.reshape(1, H), w2b, b2b.reshape(1, Fx),
    )


def node_model_ref(x, edge_index, edge_attr, params):
    """Pure-JAX reference matching the PyTorch forward."""
    (w1a, b1a, w1b, b1b, w2a, b2a, w2b, b2b) = params
    row, col = edge_index[0], edge_index[1]
    N = x.shape[0]
    out = jnp.concatenate([x[col], edge_attr], axis=1)
    out = jnp.maximum(out @ w1a + b1a, 0.0) @ w1b + b1b
    ssum = jax.ops.segment_sum(out, row, num_segments=N)
    cnt = jax.ops.segment_sum(jnp.ones((out.shape[0], 1), jnp.float32), row,
                              num_segments=N)
    mean = ssum / jnp.maximum(cnt, 1.0)
    out = jnp.concatenate([x, mean], axis=1)
    return jnp.maximum(out @ w2a + b2a, 0.0) @ w2b + b2b


if __name__ == "__main__":
    # Small shapes consistent with the module's forward.
    num_node_attr = 4    # F_x
    num_edge_attr = 3    # F_e
    num_global_attr = 5  # F_u (unused by forward)
    hiddens = 32
    N, E, B = 8, 16, 2

    key = jax.random.PRNGKey(0)
    ks = jax.random.split(key, 12)

    in1 = num_node_attr + num_edge_attr
    in2 = hiddens + num_node_attr

    def init_linear(kw, kb, fan_in, fan_out):
        bound = 1.0 / jnp.sqrt(jnp.float32(fan_in))
        w = jax.random.uniform(kw, (fan_in, fan_out), jnp.float32, -bound, bound)
        b = jax.random.uniform(kb, (fan_out,), jnp.float32, -bound, bound)
        return w, b

    w1a, b1a = init_linear(ks[0], ks[1], in1, hiddens)
    w1b, b1b = init_linear(ks[2], ks[3], hiddens, hiddens)
    w2a, b2a = init_linear(ks[4], ks[5], in2, hiddens)
    w2b, b2b = init_linear(ks[6], ks[7], hiddens, num_node_attr)
    params = (w1a, b1a, w1b, b1b, w2a, b2a, w2b, b2b)

    x = jax.random.normal(ks[8], (N, num_node_attr), jnp.float32)
    edge_attr = jax.random.normal(ks[9], (E, num_edge_attr), jnp.float32)
    edge_index = jax.random.randint(ks[10], (2, E), 0, N, jnp.int32)
    u = jax.random.normal(ks[11], (B, num_global_attr), jnp.float32)   # unused by forward
    batch = jnp.concatenate([jnp.zeros(N // 2, jnp.int32),
                             jnp.ones(N - N // 2, jnp.int32)])          # unused by forward

    out = node_model_pallas(x, edge_index, edge_attr, params)
    out = jax.block_until_ready(out)

    ref = node_model_ref(x, edge_index, edge_attr, params)
    assert out.shape == (N, num_node_attr)
    assert jnp.allclose(out, ref, atol=1e-4, rtol=1e-4), (
        f"max abs err {jnp.max(jnp.abs(out - ref))}")

    print("KERNEL_OK")
</pallas_src>

<mosaic_0001>
module attributes {stable_mosaic.version = 11 : i64} {
  func.func @node_model_kernel(%arg0: i32, %arg1: memref<8x4xf32, #tpu.memory_space<vmem>>, %arg2: memref<128x3xf32, #tpu.memory_space<vmem>>, %arg3: memref<128x1xi32, #tpu.memory_space<vmem>>, %arg4: memref<1x128xi32, #tpu.memory_space<vmem>>, %arg5: memref<4x32xf32, #tpu.memory_space<vmem>>, %arg6: memref<3x32xf32, #tpu.memory_space<vmem>>, %arg7: memref<1x32xf32, #tpu.memory_space<vmem>>, %arg8: memref<32x32xf32, #tpu.memory_space<vmem>>, %arg9: memref<1x32xf32, #tpu.memory_space<vmem>>, %arg10: memref<4x32xf32, #tpu.memory_space<vmem>>, %arg11: memref<32x32xf32, #tpu.memory_space<vmem>>, %arg12: memref<1x32xf32, #tpu.memory_space<vmem>>, %arg13: memref<32x4xf32, #tpu.memory_space<vmem>>, %arg14: memref<1x4xf32, #tpu.memory_space<vmem>>, %arg15: memref<8x4xf32, #tpu.memory_space<vmem>>, %arg16: memref<8x32xf32, #tpu.memory_space<vmem>>, %arg17: memref<8x1xf32, #tpu.memory_space<vmem>>) attributes {dimension_semantics = [#tpu.dimension_semantics<arbitrary>], iteration_bounds = array<i64: 1>, scalar_prefetch = 0 : i64, scratch_operands = 2 : i64, tpu.core_type = #tpu.core_type<tc>, window_params = [{pipeline_mode = #tpu.pipeline_mode<synchronous>, transform_indices = @transform_0, window_bounds = array<i64: 8, 4>}, {transform_indices = @transform_1, window_bounds = array<i64: 128, 3>}, {transform_indices = @transform_2, window_bounds = array<i64: 128, 1>}, {transform_indices = @transform_3, window_bounds = array<i64: 1, 128>}, {pipeline_mode = #tpu.pipeline_mode<synchronous>, transform_indices = @transform_4, window_bounds = array<i64: 4, 32>}, {pipeline_mode = #tpu.pipeline_mode<synchronous>, transform_indices = @transform_5, window_bounds = array<i64: 3, 32>}, {pipeline_mode = #tpu.pipeline_mode<synchronous>, transform_indices = @transform_6, window_bounds = array<i64: 1, 32>}, {pipeline_mode = #tpu.pipeline_mode<synchronous>, transform_indices = @transform_7, window_bounds = array<i64: 32, 32>}, {pipeline_mode = #tpu.pipeline_mode<synchronous>, transform_indices = @transform_8, window_bounds = array<i64: 1, 32>}, {pipeline_mode = #tpu.pipeline_mode<synchronous>, transform_indices = @transform_9, window_bounds = array<i64: 4, 32>}, {pipeline_mode = #tpu.pipeline_mode<synchronous>, transform_indices = @transform_10, window_bounds = array<i64: 32, 32>}, {pipeline_mode = #tpu.pipeline_mode<synchronous>, transform_indices = @transform_11, window_bounds = array<i64: 1, 32>}, {pipeline_mode = #tpu.pipeline_mode<synchronous>, transform_indices = @transform_12, window_bounds = array<i64: 32, 4>}, {pipeline_mode = #tpu.pipeline_mode<synchronous>, transform_indices = @transform_13, window_bounds = array<i64: 1, 4>}, {pipeline_mode = #tpu.pipeline_mode<synchronous>, transform_indices = @transform_14, window_bounds = array<i64: 8, 4>}]} {
    %c0_i32 = arith.constant 0 : i32
    %0 = arith.cmpi eq, %arg0, %c0_i32 : i32
    %1 = arith.extui %0 : i1 to i32
    %c0_i32_0 = arith.constant 0 : i32
    %2 = arith.cmpi ne, %1, %c0_i32_0 : i32
    scf.if %2 {
      %cst_34 = arith.constant 0.000000e+00 : f32
      %45 = vector.broadcast %cst_34 : f32 to vector<8x32xf32>
      %c0_35 = arith.constant 0 : index
      %c0_36 = arith.constant 0 : index
      %46 = vector.load %arg16[%c0_35, %c0_36] : memref<8x32xf32, #tpu.memory_space<vmem>>, vector<8x32xf32>
      tpu.vector_store %arg16[%c0_35, %c0_36], %45 {strides = array<i32>} : memref<8x32xf32, #tpu.memory_space<vmem>>, vector<8x32xf32>,
      %cst_37 = arith.constant 0.000000e+00 : f32
      %47 = vector.broadcast %cst_37 : f32 to vector<8x1xf32>
      %c0_38 = arith.constant 0 : index
      %c0_39 = arith.constant 0 : index
      %48 = vector.load %arg17[%c0_38, %c0_39] : memref<8x1xf32, #tpu.memory_space<vmem>>, vector<8x1xf32>
      tpu.vector_store %arg17[%c0_38, %c0_39], %47 {strides = array<i32>} : memref<8x1xf32, #tpu.memory_space<vmem>>, vector<8x1xf32>,
    } else {
    }
    %c0 = arith.constant 0 : index
    %c0_1 = arith.constant 0 : index
    %3 = vector.load %arg1[%c0, %c0_1] : memref<8x4xf32, #tpu.memory_space<vmem>>, vector<8x4xf32>
    %c0_2 = arith.constant 0 : index
    %c0_3 = arith.constant 0 : index
    %4 = vector.load %arg2[%c0_2, %c0_3] : memref<128x3xf32, #tpu.memory_space<vmem>>, vector<128x3xf32>
    %c0_4 = arith.constant 0 : index
    %c0_5 = arith.constant 0 : index
    %5 = vector.load %arg3[%c0_4, %c0_5] : memref<128x1xi32, #tpu.memory_space<vmem>>, vector<128x1xi32>
    %c0_6 = arith.constant 0 : index
    %c0_7 = arith.constant 0 : index
    %6 = vector.load %arg4[%c0_6, %c0_7] : memref<1x128xi32, #tpu.memory_space<vmem>>, vector<1x128xi32>
    %c0_8 = arith.constant 0 : index
    %c0_9 = arith.constant 0 : index
    %7 = vector.load %arg5[%c0_8, %c0_9] : memref<4x32xf32, #tpu.memory_space<vmem>>, vector<4x32xf32>
    %cst = arith.constant dense<0.000000e+00> : vector<8x32xf32>
    %8 = tpu.matmul %3, %7, %cst {dimension_numbers = #tpu.dot_dimension_numbers<[1], [0], [0], [1], [0, 0, 1, 1], [], []>} : vector<8x4xf32>, vector<4x32xf32>, vector<8x32xf32> -> vector<8x32xf32>
    %9 = tpu.iota {dimensions = array<i32: 1>} : vector<128x8xi32>
    %10 = vector.broadcast %5 : vector<128x1xi32> to vector<128x8xi32>
    %11 = arith.cmpi eq, %10, %9 : vector<128x8xi32>
    %12 = arith.extui %11 : vector<128x8xi1> to vector<128x8xi32>
    %13 = arith.sitofp %12 : vector<128x8xi32> to vector<128x8xf32>
    %cst_10 = arith.constant dense<0.000000e+00> : vector<128x32xf32>
    %14 = tpu.matmul %13, %8, %cst_10 {dimension_numbers = #tpu.dot_dimension_numbers<[1], [0], [0], [1], [0, 0, 1, 1], [], []>} : vector<128x8xf32>, vector<8x32xf32>, vector<128x32xf32> -> vector<128x32xf32>
    %c0_11 = arith.constant 0 : index
    %c0_12 = arith.constant 0 : index
    %15 = vector.load %arg6[%c0_11, %c0_12] : memref<3x32xf32, #tpu.memory_space<vmem>>, vector<3x32xf32>
    %cst_13 = arith.constant dense<0.000000e+00> : vector<128x32xf32>
    %16 = tpu.matmul %4, %15, %cst_13 {dimension_numbers = #tpu.dot_dimension_numbers<[1], [0], [0], [1], [0, 0, 1, 1], [], []>} : vector<128x3xf32>, vector<3x32xf32>, vector<128x32xf32> -> vector<128x32xf32>
    %17 = arith.addf %14, %16 : vector<128x32xf32>
    %c0_14 = arith.constant 0 : index
    %c0_15 = arith.constant 0 : index
    %18 = vector.load %arg7[%c0_14, %c0_15] : memref<1x32xf32, #tpu.memory_space<vmem>>, vector<1x32xf32>
    %19 = vector.broadcast %18 : vector<1x32xf32> to vector<128x32xf32>
    %20 = arith.addf %17, %19 : vector<128x32xf32>
    %cst_16 = arith.constant 0.000000e+00 : f32
    %21 = vector.broadcast %cst_16 : f32 to vector<128x32xf32>
    %22 = arith.maximumf %20, %21 : vector<128x32xf32>
    %c0_17 = arith.constant 0 : index
    %c0_18 = arith.constant 0 : index
    %23 = vector.load %arg8[%c0_17, %c0_18] : memref<32x32xf32, #tpu.memory_space<vmem>>, vector<32x32xf32>
    %cst_19 = arith.constant dense<0.000000e+00> : vector<128x32xf32>
    %24 = tpu.matmul %22, %23, %cst_19 {dimension_numbers = #tpu.dot_dimension_numbers<[1], [0], [0], [1], [0, 0, 1, 1], [], []>} : vector<128x32xf32>, vector<32x32xf32>, vector<128x32xf32> -> vector<128x32xf32>
    %c0_20 = arith.constant 0 : index
    %c0_21 = arith.constant 0 : index
    %25 = vector.load %arg9[%c0_20, %c0_21] : memref<1x32xf32, #tpu.memory_space<vmem>>, vector<1x32xf32>
    %26 = vector.broadcast %25 : vector<1x32xf32> to vector<128x32xf32>
    %27 = arith.addf %24, %26 : vector<128x32xf32>
    %28 = tpu.iota {dimensions = array<i32: 0>} : vector<8x128xi32>
    %29 = vector.broadcast %6 : vector<1x128xi32> to vector<8x128xi32>
    %30 = arith.cmpi eq, %28, %29 : vector<8x128xi32>
    %31 = arith.extui %30 : vector<8x128xi1> to vector<8x128xi32>
    %32 = arith.sitofp %31 : vector<8x128xi32> to vector<8x128xf32>
    %c0_22 = arith.constant 0 : index
    %c0_23 = arith.constant 0 : index
    %33 = vector.load %arg16[%c0_22, %c0_23] : memref<8x32xf32, #tpu.memory_space<vmem>>, vector<8x32xf32>
    %cst_24 = arith.constant dense<0.000000e+00> : vector<8x32xf32>
    %34 = tpu.matmul %32, %27, %cst_24 {dimension_numbers = #tpu.dot_dimension_numbers<[1], [0], [0], [1], [0, 0, 1, 1], [], []>} : vector<8x128xf32>, vector<128x32xf32>, vector<8x32xf32> -> vector<8x32xf32>
    %35 = arith.addf %33, %34 : vector<8x32xf32>
    %c0_25 = arith.constant 0 : index
    %c0_26 = arith.constant 0 : index
    %36 = vector.load %arg16[%c0_25, %c0_26] : memref<8x32xf32, #tpu.memory_space<vmem>>, vector<8x32xf32>
    tpu.vector_store %arg16[%c0_25, %c0_26], %35 {strides = array<i32>} : memref<8x32xf32, #tpu.memory_space<vmem>>, vector<8x32xf32>,
    %c0_27 = arith.constant 0 : index
    %c0_28 = arith.constant 0 : index
    %37 = vector.load %arg17[%c0_27, %c0_28] : memref<8x1xf32, #tpu.memory_space<vmem>>, vector<8x1xf32>
    %cst_29 = arith.constant dense<0.000000e+00> : vector<8xf32>
    %38 = vector.multi_reduction <add>, %32, %cst_29 [1] : vector<8x128xf32> to vector<8xf32>
    %39 = vector.shape_cast %38 : vector<8xf32> to vector<8x1xf32>
    %40 = arith.addf %37, %39 : vector<8x1xf32>
    %c0_30 = arith.constant 0 : index
    %c0_31 = arith.constant 0 : index
    %41 = vector.load %arg17[%c0_30, %c0_31] : memref<8x1xf32, #tpu.memory_space<vmem>>, vector<8x1xf32>
    tpu.vector_store %arg17[%c0_30, %c0_31], %40 {strides = array<i32>} : memref<8x1xf32, #tpu.memory_space<vmem>>, vector<8x1xf32>,
    %c0_i32_32 = arith.constant 0 : i32
    %42 = arith.cmpi eq, %arg0, %c0_i32_32 : i32
    %43 = arith.extui %42 : i1 to i32
    %c0_i32_33 = arith.constant 0 : i32
    %44 = arith.cmpi ne, %43, %c0_i32_33 : i32
    scf.if %44 {
      %c0_34 = arith.constant 0 : index
      %c0_35 = arith.constant 0 : index
      %45 = vector.load %arg16[%c0_34, %c0_35] : memref<8x32xf32, #tpu.memory_space<vmem>>, vector<8x32xf32>
      %c0_36 = arith.constant 0 : index
      %c0_37 = arith.constant 0 : index
      %46 = vector.load %arg17[%c0_36, %c0_37] : memref<8x1xf32, #tpu.memory_space<vmem>>, vector<8x1xf32>
      %cst_38 = arith.constant 1.000000e+00 : f32
      %47 = vector.broadcast %cst_38 : f32 to vector<8x1xf32>
      %48 = arith.maximumf %46, %47 : vector<8x1xf32>
      %49 = tpu.reciprocal %48 : vector<8x1xf32> -> vector<8x1xf32>
      %50 = vector.broadcast %49 : vector<8x1xf32> to vector<8x32xf32>
      %51 = arith.mulf %45, %50 : vector<8x32xf32>
      %c0_39 = arith.constant 0 : index
      %c0_40 = arith.constant 0 : index
      %52 = vector.load %arg10[%c0_39, %c0_40] : memref<4x32xf32, #tpu.memory_space<vmem>>, vector<4x32xf32>
      %cst_41 = arith.constant dense<0.000000e+00> : vector<8x32xf32>
      %53 = tpu.matmul %3, %52, %cst_41 {dimension_numbers = #tpu.dot_dimension_numbers<[1], [0], [0], [1], [0, 0, 1, 1], [], []>} : vector<8x4xf32>, vector<4x32xf32>, vector<8x32xf32> -> vector<8x32xf32>
      %c0_42 = arith.constant 0 : index
      %c0_43 = arith.constant 0 : index
      %54 = vector.load %arg11[%c0_42, %c0_43] : memref<32x32xf32, #tpu.memory_space<vmem>>, vector<32x32xf32>
      %cst_44 = arith.constant dense<0.000000e+00> : vector<8x32xf32>
      %55 = tpu.matmul %51, %54, %cst_44 {dimension_numbers = #tpu.dot_dimension_numbers<[1], [0], [0], [1], [0, 0, 1, 1], [], []>} : vector<8x32xf32>, vector<32x32xf32>, vector<8x32xf32> -> vector<8x32xf32>
      %56 = arith.addf %53, %55 : vector<8x32xf32>
      %c0_45 = arith.constant 0 : index
      %c0_46 = arith.constant 0 : index
      %57 = vector.load %arg12[%c0_45, %c0_46] : memref<1x32xf32, #tpu.memory_space<vmem>>, vector<1x32xf32>
      %58 = vector.broadcast %57 : vector<1x32xf32> to vector<8x32xf32>
      %59 = arith.addf %56, %58 : vector<8x32xf32>
      %cst_47 = arith.constant 0.000000e+00 : f32
      %60 = vector.broadcast %cst_47 : f32 to vector<8x32xf32>
      %61 = arith.maximumf %59, %60 : vector<8x32xf32>
      %c0_48 = arith.constant 0 : index
      %c0_49 = arith.constant 0 : index
      %62 = vector.load %arg13[%c0_48, %c0_49] : memref<32x4xf32, #tpu.memory_space<vmem>>, vector<32x4xf32>
      %cst_50 = arith.constant dense<0.000000e+00> : vector<8x4xf32>
      %63 = tpu.matmul %61, %62, %cst_50 {dimension_numbers = #tpu.dot_dimension_numbers<[1], [0], [0], [1], [0, 0, 1, 1], [], []>} : vector<8x32xf32>, vector<32x4xf32>, vector<8x4xf32> -> vector<8x4xf32>
      %c0_51 = arith.constant 0 : index
      %c0_52 = arith.constant 0 : index
      %64 = vector.load %arg14[%c0_51, %c0_52] : memref<1x4xf32, #tpu.memory_space<vmem>>, vector<1x4xf32>
      %65 = vector.broadcast %64 : vector<1x4xf32> to vector<8x4xf32>
      %66 = arith.addf %63, %65 : vector<8x4xf32>
      %c0_53 = arith.constant 0 : index
      %c0_54 = arith.constant 0 : index
      %67 = vector.load %arg15[%c0_53, %c0_54] : memref<8x4xf32, #tpu.memory_space<vmem>>, vector<8x4xf32>
      tpu.vector_store %arg15[%c0_53, %c0_54], %66 {strides = array<i32>} : memref<8x4xf32, #tpu.memory_space<vmem>>, vector<8x4xf32>,
    } else {
    }
    return
  }
  func.func @transform_0(%arg0: i32) -> (i32, i32) {
    %c0_i32 = arith.constant 0 : i32
    %c0_i32_0 = arith.constant 0 : i32
    %c0_i32_1 = arith.constant 0 : i32
    return %c0_i32, %c0_i32_0 : i32, i32
  }
  func.func @transform_1(%arg0: i32) -> (i32, i32) {
    %c0_i32 = arith.constant 0 : i32
    %c0_i32_0 = arith.constant 0 : i32
    return %arg0, %c0_i32 : i32, i32
  }
  func.func @transform_2(%arg0: i32) -> (i32, i32) {
    %c0_i32 = arith.constant 0 : i32
    %c0_i32_0 = arith.constant 0 : i32
    return %arg0, %c0_i32 : i32, i32
  }
  func.func @transform_3(%arg0: i32) -> (i32, i32) {
    %c0_i32 = arith.constant 0 : i32
    %c0_i32_0 = arith.constant 0 : i32
    return %c0_i32, %arg0 : i32, i32
  }
  func.func @transform_4(%arg0: i32) -> (i32, i32) {
    %c0_i32 = arith.constant 0 : i32
    %c0_i32_0 = arith.constant 0 : i32
    %c0_i32_1 = arith.constant 0 : i32
    return %c0_i32, %c0_i32_0 : i32, i32
  }
  func.func @transform_5(%arg0: i32) -> (i32, i32) {
    %c0_i32 = arith.constant 0 : i32
    %c0_i32_0 = arith.constant 0 : i32
    %c0_i32_1 = arith.constant 0 : i32
    return %c0_i32, %c0_i32_0 : i32, i32
  }
  func.func @transform_6(%arg0: i32) -> (i32, i32) {
    %c0_i32 = arith.constant 0 : i32
    %c0_i32_0 = arith.constant 0 : i32
    %c0_i32_1 = arith.constant 0 : i32
    return %c0_i32, %c0_i32_0 : i32, i32
  }
  func.func @transform_7(%arg0: i32) -> (i32, i32) {
    %c0_i32 = arith.constant 0 : i32
    %c0_i32_0 = arith.constant 0 : i32
    %c0_i32_1 = arith.constant 0 : i32
    return %c0_i32, %c0_i32_0 : i32, i32
  }
  func.func @transform_8(%arg0: i32) -> (i32, i32) {
    %c0_i32 = arith.constant 0 : i32
    %c0_i32_0 = arith.constant 0 : i32
    %c0_i32_1 = arith.constant 0 : i32
    return %c0_i32, %c0_i32_0 : i32, i32
  }
  func.func @transform_9(%arg0: i32) -> (i32, i32) {
    %c0_i32 = arith.constant 0 : i32
    %c0_i32_0 = arith.constant 0 : i32
    %c0_i32_1 = arith.constant 0 : i32
    return %c0_i32, %c0_i32_0 : i32, i32
  }
  func.func @transform_10(%arg0: i32) -> (i32, i32) {
    %c0_i32 = arith.constant 0 : i32
    %c0_i32_0 = arith.constant 0 : i32
    %c0_i32_1 = arith.constant 0 : i32
    return %c0_i32, %c0_i32_0 : i32, i32
  }
  func.func @transform_11(%arg0: i32) -> (i32, i32) {
    %c0_i32 = arith.constant 0 : i32
    %c0_i32_0 = arith.constant 0 : i32
    %c0_i32_1 = arith.constant 0 : i32
    return %c0_i32, %c0_i32_0 : i32, i32
  }
  func.func @transform_12(%arg0: i32) -> (i32, i32) {
    %c0_i32 = arith.constant 0 : i32
    %c0_i32_0 = arith.constant 0 : i32
    %c0_i32_1 = arith.constant 0 : i32
    return %c0_i32, %c0_i32_0 : i32, i32
  }
  func.func @transform_13(%arg0: i32) -> (i32, i32) {
    %c0_i32 = arith.constant 0 : i32
    %c0_i32_0 = arith.constant 0 : i32
    %c0_i32_1 = arith.constant 0 : i32
    return %c0_i32, %c0_i32_0 : i32, i32
  }
  func.func @transform_14(%arg0: i32) -> (i32, i32) {
    %c0_i32 = arith.constant 0 : i32
    %c0_i32_0 = arith.constant 0 : i32
    %c0_i32_1 = arith.constant 0 : i32
    return %c0_i32, %c0_i32_0 : i32, i32
  }
}

</mosaic_0001>

<bundles_post_ra>
// kernel: tpu_custom_call.1
= control target key start
LH: loop header
LB: loop body
LE: loop exit
PB: predicated region body
PF: predicated region fallthrough
CT: control target
= control target key end

     0   :  { %vm94_vm0 = vcmask 1043456   ;;  %v1575_v0 = vmov 0   ;;  %v1576_v1 = vmov 0.0   ;;  %vm90_vm1 = vcmask 31744   ;;  %s1982_s4 = inlined_call_operand.vmem [shape: f32[4,32], index: 4, kind: input, shape index: {}]   ;;  %s1983_s2 = inlined_call_operand.vmem [shape: s32[128,1], index: 2, kind: input, shape index: {}]   ;;  %s1984_s0 = inlined_call_operand.vmem [shape: f32[8,4], index: 0, kind: input, shape index: {}]   ;;  %s1985_s3 = inlined_call_operand.vmem [shape: s32[1,128], index: 3, kind: input, shape index: {}]   ;;  %s1986_s5 = inlined_call_operand.vmem [shape: f32[3,32], index: 5, kind: input, shape index: {}]   ;;  %s1987_s1 = inlined_call_operand.vmem [shape: f32[128,3], index: 1, kind: input, shape index: {}]   ;;  %s1988_s7 = inlined_call_operand.vmem [shape: f32[32,32], index: 7, kind: input, shape index: {}]   ;;  %s1989_s6 = inlined_call_operand.vmem [shape: f32[1,32], index: 6, kind: input, shape index: {}]   ;;  %s1990_s8 = inlined_call_operand.vmem [shape: f32[1,32], index: 8, kind: input, shape index: {}]   ;;  %s1991_s10 = inlined_call_operand.vmem [shape: f32[32,32], index: 10, kind: input, shape index: {}]   ;;  %s1992_s9 = inlined_call_operand.vmem [shape: f32[4,32], index: 9, kind: input, shape index: {}]   ;;  %s1993_s12 = inlined_call_operand.vmem [shape: f32[32,4], index: 12, kind: input, shape index: {}]   ;;  %s1994_s11 = inlined_call_operand.vmem [shape: f32[1,32], index: 11, kind: input, shape index: {}]   ;;  %s1995_s13 = inlined_call_operand.vmem [shape: f32[1,4], index: 13, kind: input, shape index: {}]   ;;  %s1996_s14 = inlined_call_operand.vmem [shape: f32[8,4], index: 14, kind: output, shape index: {}]  }
   0x1   :  { %1571 = vset.pattern.permute.xlu0 %v1575_v0  ;;  %1416 = vmatprep.subr.mxu0 %v1576_v1  ;;  %v89_v2 = vld [vmem:[%s1982_s4] sm:$0xf]  ;;  %vm1577_vm2 = vmmov 0   ;;  %v73_v5 = vld [vmem:[%s1983_s2 + $0x8] sm:$0xff]  ;;  %v74_v6 = vld [vmem:[%s1983_s2 + $0x10] sm:$0xff]  ;;  %v168_v20 = vlaneseq  ;;  %vm53_vm4 = vcmask 7168  }
   0x2   :  { %v72_v3 = vld [vmem:[%s1983_s2] sm:$0xff]  ;;  %1417 = vmatpush3.msk.msra.mxu0 %vm94_vm0, %v89_v2  ;;  %1418 = vmatprep.mubr.msk.f32.mxu0 %vm1577_vm2, %v1576_v1  ;;  %v75_v7 = vld [vmem:[%s1983_s2 + $0x18] sm:$0xff]  ;;  %v77_v9 = vld [vmem:[%s1983_s2 + $0x28] sm:$0xff]  ;;  %54 = vst.msk [vmem:[#allocation3] sm:$0xff] %vm53_vm4, %v1576_v1  ;;  %vm316_vm5 = vcmask 1042432   ;;  %vm267_vm6 = vcmask 23552  }
   0x3   :  { %v1664_v4 = vld [vmem:[%s1984_s0] sm:$0xff]  ;;  %171 = vperm.xlu0 %1571, %v72_v3   ;;  %1572 = vset.pattern.permute.xlu1 %v1575_v0  ;;  %v78_v10 = vld [vmem:[%s1983_s2 + $0x30] sm:$0xff]  ;;  %v79_v11 = vld [vmem:[%s1983_s2 + $0x38] sm:$0xff]  ;;  %v1716_v21 = vshrl.u32 %v168_v20, 7  ;;  %v1798_v41 = vand.u32 127, %v168_v20  ;;  %vm465_vm7 = vcmask 64512  }
   0x4   :  { %1419 = vmatmul.mubr.msk.f32.vlgmr.msra.gmra.mxu0 %vm90_vm1, %v1664_v4  ;;  %177 = vperm.xlu1 %1572, %v74_v6   ;;  %v76_v8 = vld [vmem:[%s1983_s2 + $0x20] sm:$0xff]  ;;  %v81_v13 = vld [vmem:[%s1983_s2 + $0x48] sm:$0xff]  ;;  %v82_v14 = vld [vmem:[%s1983_s2 + $0x50] sm:$0xff] }
   0x5   :  { %v80_v12 = vld [vmem:[%s1983_s2 + $0x40] sm:$0xff]  ;;  %v83_v15 = vld [vmem:[%s1983_s2 + $0x58] sm:$0xff]  ;;  %v85_v17 = vld [vmem:[%s1983_s2 + $0x68] sm:$0xff] }
   0x6   :  { %v84_v16 = vld [vmem:[%s1983_s2 + $0x60] sm:$0xff]  ;;  %v86_v18 = vld [vmem:[%s1983_s2 + $0x70] sm:$0xff]  ;;  %v87_v19 = vld [vmem:[%s1983_s2 + $0x78] sm:$0xff] }
   0x7   :  { %174 = vperm.xlu0 %1571, %v73_v5   ;;  %v1721_v22 = vld [vmem:[%s1985_s3] ss:$0 sm:$0xff]  ;;  %v57_v26 = vld [vmem:[%s1987_s1 + $0x8] sm:$0xff]  ;;  %v58_v27 = vld [vmem:[%s1987_s1 + $0x10] sm:$0xff] }
   0x8   :  { %180 = vperm.xlu1 %1572, %v75_v7   ;;  %vm909_vm3 = vcmp.eq.s32.totalorder %v1716_v21, %v1721_v22  ;;  %v266_v24 = vld [vmem:[%s1986_s5] sm:$0x7]  ;;  %v59_v28 = vld [vmem:[%s1987_s1 + $0x18] sm:$0xff]  ;;  %v61_v30 = vld [vmem:[%s1987_s1 + $0x28] sm:$0xff] }
   0x9   :  { %v1323_v23 = vsel %vm909_vm3, 1.0, %v1576_v1  ;;  %1421 = vmatprep.subr.msk.mxu1 %vm316_vm5, %v266_v24  ;;  %v56_v25 = vld [vmem:[%s1987_s1] sm:$0xff]  ;;  %v62_v31 = vld [vmem:[%s1987_s1 + $0x30] sm:$0xff]  ;;  %v63_v32 = vld [vmem:[%s1987_s1 + $0x38] sm:$0xff] }
   0xa   :  { %1422 = vmatpush3.msk.msra.mxu1 %vm316_vm5, %v266_v24  ;;  %1423 = vmatprep.mubr.msk.f32.mxu1 %vm267_vm6, %v56_v25  ;;  %v60_v29 = vld [vmem:[%s1987_s1 + $0x20] sm:$0xff]  ;;  %v65_v34 = vld [vmem:[%s1987_s1 + $0x48] sm:$0xff]  ;;  %v66_v35 = vld [vmem:[%s1987_s1 + $0x50] sm:$0xff] }
   0xb   :  { %183 = vperm.xlu0 %1571, %v76_v8   ;;  %1424 = vmatmul.mubr.msk.f32.vlgmr.msra.gmra.mxu1 %vm267_vm6, %v57_v26  ;;  %v64_v33 = vld [vmem:[%s1987_s1 + $0x40] sm:$0xff]  ;;  %v67_v36 = vld [vmem:[%s1987_s1 + $0x58] sm:$0xff]  ;;  %v69_v38 = vld [vmem:[%s1987_s1 + $0x68] sm:$0xff] }
   0xc   :  { %186 = vperm.xlu1 %1572, %v77_v9   ;;  %1426 = vmatprep.mubr.msk.f32.mxu1 %vm267_vm6, %v58_v27  ;;  %v68_v37 = vld [vmem:[%s1987_s1 + $0x60] sm:$0xff]  ;;  %v70_v39 = vld [vmem:[%s1987_s1 + $0x70] sm:$0xff]  ;;  %v71_v40 = vld [vmem:[%s1987_s1 + $0x78] sm:$0xff] }
   0xd   :  { %v985_v59 = vld [vmem:[#allocation3] sm:$0xff]  ;;  %v698_v25 = vld [vmem:[%s1988_s7] sm:$0xff] }
   0xe   :  { %v699_v24 = vld [vmem:[%s1988_s7 + $0x8] sm:$0xff]  ;;  %v1005_v22 = vld [vmem:[%s1991_s10] sm:$0xff] }
   0xf   :  { %189 = vperm.xlu0 %1571, %v78_v10   ;;  %1427 = vmatmul.mubr.msk.f32.gmra.mxu1 %vm267_vm6, %v59_v28  ;;  %v1006_v21 = vld [vmem:[%s1991_s10 + $0x8] sm:$0xff] }
  0x10   :  { %192 = vperm.xlu1 %1572, %v79_v11   ;;  %1429 = vmatprep.mubr.msk.f32.mxu1 %vm267_vm6, %v60_v29 }
  0x13   :  { %195 = vperm.xlu0 %1571, %v80_v12   ;;  %1430 = vmatmul.mubr.msk.f32.gmra.mxu1 %vm267_vm6, %v61_v30 }
  0x14   :  { %198 = vperm.xlu1 %1572, %v81_v13   ;;  %1432 = vmatprep.mubr.msk.f32.mxu1 %vm267_vm6, %v62_v31 }
  0x17   :  { %201 = vperm.xlu0 %1571, %v82_v14   ;;  %1433 = vmatmul.mubr.msk.f32.gmra.mxu1 %vm267_vm6, %v63_v32 }
  0x18   :  { %204 = vperm.xlu1 %1572, %v83_v15   ;;  %1435 = vmatprep.mubr.msk.f32.mxu1 %vm267_vm6, %v64_v33 }
  0x1b   :  { %207 = vperm.xlu0 %1571, %v84_v16   ;;  %1436 = vmatmul.mubr.msk.f32.gmra.mxu1 %vm267_vm6, %v65_v34 }
  0x1c   :  { %210 = vperm.xlu1 %1572, %v85_v17   ;;  %1438 = vmatprep.mubr.msk.f32.mxu1 %vm267_vm6, %v66_v35 }
  0x1f   :  { %213 = vperm.xlu0 %1571, %v86_v18   ;;  %1439 = vmatmul.mubr.msk.f32.gmra.mxu1 %vm267_vm6, %v67_v36  ;;  %v701_v18 = vld [vmem:[%s1988_s7 + $0x18] sm:$0xff]  ;;  %v1869_v36 = vld [vmem:[%s1989_s6] ss:$0 sm:$0xff] }
  0x20   :  { %216 = vperm.xlu1 %1572, %v87_v19   ;;  %1441 = vmatprep.mubr.msk.f32.mxu1 %vm267_vm6, %v68_v37  ;;  %v700_v19 = vld [vmem:[%s1988_s7 + $0x10] sm:$0xff] }
  0x21   :  { %1473 = vmatprep.subr.mxu1 %v701_v18 }
  0x22   :  { %1474 = vmatpush3.msra.mxu1 %v701_v18 }
  0x23   :  { %1442 = vmatmul.mubr.msk.f32.gmra.mxu1 %vm267_vm6, %v69_v38  ;;  %1475 = vmatprep.subr.mxu1 %v700_v19 }
  0x24   :  { %1444 = vmatprep.mubr.msk.f32.mxu1 %vm267_vm6, %v70_v39  ;;  %1476 = vmatpush3.msra.mxu1 %v700_v19 }
  0x25   :  { %1477 = vmatprep.subr.mxu1 %v699_v24 }
  0x26   :  { %1478 = vmatpush3.msra.mxu1 %v699_v24 }
  0x27   :  { %1445 = vmatmul.mubr.msk.f32.gmra.mxu1 %vm267_vm6, %v71_v40  ;;  %1479 = vmatprep.subr.mxu1 %v698_v25 }
  0x28   :  { %1480 = vmatpush3.msra.mxu1 %v698_v25 }
  0x3e   :  { %986 = vadd.xlane.f32.xlu0 %v1323_v23 }
  0x7e   :  { %v172_v42 = vpop.permute.xlu0 %171 }
  0x7f   :  { %vm218_vm8 = vcmp.eq.s32.totalorder %v172_v42, %v1798_v41  ;;  %v178_v47 = vpop.permute.xlu1 %177 }
  0x80   :  { %v1255_v43 = vsel %vm218_vm8, 1.0, %v1576_v1  ;;  %vm220_vm9 = vcmp.eq.s32.totalorder %v178_v47, %v1798_v41 }
  0x81   :  { %1449 = vmatprep.mubr.msk.f32.mxu0 %vm465_vm7, %v1255_v43  ;;  %v1257_v56 = vsel %vm220_vm9, 1.0, %v1576_v1 }
  0x82   :  { %v175_v44 = vpop.permute.xlu0 %174 }
  0x83   :  { %v181_v49 = vpop.permute.xlu1 %180  ;;  %vm219_vm10 = vcmp.eq.s32.totalorder %v175_v44, %v1798_v41 }
  0x84   :  { %v1256_v57 = vsel %vm219_vm10, 1.0, %v1576_v1  ;;  %vm221_vm11 = vcmp.eq.s32.totalorder %v181_v49, %v1798_v41 }
  0x85   :  { %v1258_v62 = vsel %vm221_vm11, 1.0, %v1576_v1 }
  0x86   :  { %v184_v45 = vpop.permute.xlu0 %183 }
  0x87   :  { %v187_v51 = vpop.permute.xlu1 %186  ;;  %vm222_vm12 = vcmp.eq.s32.totalorder %v184_v45, %v1798_v41 }
  0x88   :  { %v1259_v0 = vsel %vm222_vm12, 1.0, %v1576_v1  ;;  %vm223_vm13 = vcmp.eq.s32.totalorder %v187_v51, %v1798_v41 }
  0x89   :  { %v1260_v2 = vsel %vm223_vm13, 1.0, %v1576_v1  ;;  %vm51_vm13 = vcmask 261120  }
  0x8a   :  { %v190_v46 = vpop.permute.xlu0 %189  ;;  %52 = vst.msk [vmem:[#allocation2] sm:$0xff] %vm51_vm13, %v1576_v1 }
  0x8b   :  { %v193_v53 = vpop.permute.xlu1 %192  ;;  %vm224_vm14 = vcmp.eq.s32.totalorder %v190_v46, %v1798_v41 }
  0x8c   :  { %v1261_v3 = vsel %vm224_vm14, 1.0, %v1576_v1  ;;  %vm225_vm15 = vcmp.eq.s32.totalorder %v193_v53, %v1798_v41 }
  0x8d   :  { %v1262_v6 = vsel %vm225_vm15, 1.0, %v1576_v1 }
  0x8e   :  { %v196_v48 = vpop.permute.xlu0 %195 }
  0x8f   :  { %v199_v63 = vpop.permute.xlu1 %198  ;;  %vm226_vm5 = vcmp.eq.s32.totalorder %v196_v48, %v1798_v41 }
  0x90   :  { %v1263_v8 = vsel %vm226_vm5, 1.0, %v1576_v1 }
  0x92   :  { %v202_v50 = vpop.permute.xlu0 %201 }
  0x93   :  { %v205_v5 = vpop.permute.xlu1 %204  ;;  %vm228_vm6 = vcmp.eq.s32.totalorder %v202_v50, %v1798_v41 }
  0x94   :  { %v1265_v12 = vsel %vm228_vm6, 1.0, %v1576_v1  ;;  %vm229_vm8 = vcmp.eq.s32.totalorder %v205_v5, %v1798_v41 }
  0x95   :  { %v1266_v13 = vsel %vm229_vm8, 1.0, %v1576_v1 }
  0x96   :  { %v208_v52 = vpop.permute.xlu0 %207 }
  0x97   :  { %v211_v11 = vpop.permute.xlu1 %210  ;;  %vm230_vm9 = vcmp.eq.s32.totalorder %v208_v52, %v1798_v41 }
  0x98   :  { %v1267_v14 = vsel %vm230_vm9, 1.0, %v1576_v1  ;;  %vm231_vm10 = vcmp.eq.s32.totalorder %v211_v11, %v1798_v41 }
  0x99   :  { %v1268_v16 = vsel %vm231_vm10, 1.0, %v1576_v1 }
  0x9a   :  { %v214_v54 = vpop.permute.xlu0 %213 }
  0x9b   :  { %vm232_vm11 = vcmp.eq.s32.totalorder %v214_v54, %v1798_v41  ;;  %v217_v15 = vpop.permute.xlu1 %216 }
  0x9c   :  { %v1269_v17 = vsel %vm232_vm11, 1.0, %v1576_v1  ;;  %vm233_vm12 = vcmp.eq.s32.totalorder %v217_v15, %v1798_v41 }
  0x9d   :  { %v1270_v23 = vsel %vm233_vm12, 1.0, %v1576_v1 }
  0xc4   :  { %v164_v55 = vpop.f32.mrf.mxu0 }
  0xc5   :  { %1447 = vmatprep.subr.mxu0 %v164_v55 }
  0xc6   :  { %v1420_v58 = vpop.f32.mrf.mxu0  ;;  %1448 = vmatpush3.msra.mxu0 %v164_v55 }
  0xc7   :  { %1450 = vmatmul.mubr.msk.f32.vlgmr.msra.gmra.mxu0 %vm465_vm7, %v1256_v57  ;;  %1505 = vmatprep.subr.mxu0 %v1576_v1  ;;  %v987_v60 = vpop.xlane.xlu0 %986 }
  0xc8   :  { %1452 = vmatprep.mubr.msk.f32.mxu0 %vm465_vm7, %v1257_v56  ;;  %v988_v61 = vadd.f32 %v987_v60, %v985_v59 }
  0xca   :  { %990 = vst.msk [vmem:[#allocation3] sm:$0xff] %vm53_vm4, %v988_v61  ;;  %vm227_vm4 = vcmp.eq.s32.totalorder %v199_v63, %v1798_v41 }
  0xcb   :  { %1453 = vmatmul.mubr.msk.f32.gmra.mxu0 %vm465_vm7, %v1258_v62  ;;  %v1264_v10 = vsel %vm227_vm4, 1.0, %v1576_v1  ;;  %v1425_v26 = vpop.f32.mrf.mxu1 }
  0xcc   :  { %1455 = vmatprep.mubr.msk.f32.mxu0 %vm465_vm7, %v1259_v0 }
  0xcd   :  { %v386_v27 = vpop.f32.mrf.mxu1 }
  0xcf   :  { %1456 = vmatmul.mubr.msk.f32.gmra.mxu0 %vm465_vm7, %v1260_v2  ;;  %v1428_v28 = vpop.f32.mrf.mxu1 }
  0xd0   :  { %1458 = vmatprep.mubr.msk.f32.mxu0 %vm465_vm7, %v1261_v3 }
  0xd1   :  { %v995_v7 = vld [vmem:[#allocation3] sm:$0xff]  ;;  %v396_v29 = vpop.f32.mrf.mxu1 }
  0xd2   :  { %v996_v9 = vmax.f32 %v995_v7, 1.0 }
  0xd3   :  { %1459 = vmatmul.mubr.msk.f32.gmra.mxu0 %vm465_vm7, %v1262_v6  ;;  %v1431_v30 = vpop.f32.mrf.mxu1 }
  0xd4   :  { %1461 = vmatprep.mubr.msk.f32.mxu0 %vm465_vm7, %v1263_v8  ;;  %1573 = vrcp.f32 %v996_v9 }
  0xd5   :  { %v406_v31 = vpop.f32.mrf.mxu1 }
  0xd7   :  { %1462 = vmatmul.mubr.msk.f32.gmra.mxu0 %vm465_vm7, %v1264_v10  ;;  %v1434_v32 = vpop.f32.mrf.mxu1 }
  0xd8   :  { %1464 = vmatprep.mubr.msk.f32.mxu0 %vm465_vm7, %v1265_v12 }
  0xd9   :  { %v416_v33 = vpop.f32.mrf.mxu1 }
  0xdb   :  { %1465 = vmatmul.mubr.msk.f32.gmra.mxu0 %vm465_vm7, %v1266_v13  ;;  %v1437_v38 = vpop.f32.mrf.mxu1 }
  0xdc   :  { %1467 = vmatprep.mubr.msk.f32.mxu0 %vm465_vm7, %v1267_v14 }
  0xdd   :  { %v426_v45 = vpop.f32.mrf.mxu1 }
  0xdf   :  { %1468 = vmatmul.mubr.msk.f32.gmra.mxu0 %vm465_vm7, %v1268_v16  ;;  %v1440_v54 = vpop.f32.mrf.mxu1 }
  0xe0   :  { %1470 = vmatprep.mubr.msk.f32.mxu0 %vm465_vm7, %v1269_v17 }
  0xe1   :  { %v1574_v20 = vpop.eup %1573  ;;  %v436_v63 = vpop.f32.mrf.mxu1 }
  0xe2   :  { %1000 = vperm.xlu1 %1572, %v1574_v20  }
  0xe3   :  { %1471 = vmatmul.mubr.msk.f32.gmra.mxu0 %vm465_vm7, %v1270_v23  ;;  %v1443_v10 = vpop.f32.mrf.mxu1 }
  0xe4   :  { %1537 = vmatprep.mubr.msk.f32.mxu0 %vm1577_vm2, %v1576_v1 }
  0xe5   :  { %v446_v19 = vpop.f32.mrf.mxu1 }
 0x187   :  { %v1451_v34 = vpop.f32.mrf.mxu0 }
 0x188   :  { %v586_v35 = vadd.f32 %v1451_v34, %v1425_v26 }
 0x189   :  { %v580_v37 = vpop.f32.mrf.mxu0 }
 0x18a   :  { %v581_v39 = vadd.f32 %v580_v37, %v386_v27  ;;  %v667_v40 = vadd.f32 %v1869_v36, %v586_v35 }
 0x18b   :  { %v1454_v41 = vpop.f32.mrf.mxu0 }
 0x18c   :  { %v666_v42 = vadd.f32 %v1869_v36, %v581_v39  ;;  %v596_v43 = vadd.f32 %v1454_v41, %v1428_v28  ;;  %v683_v48 = vmax.f32 %v667_v40, 0.0 }
 0x18d   :  { %v590_v44 = vpop.f32.mrf.mxu0 }
 0x18e   :  { %v682_v46 = vmax.f32 %v666_v42, 0.0  ;;  %v591_v47 = vadd.f32 %v590_v44, %v396_v29  ;;  %v669_v49 = vadd.f32 %v1869_v36, %v596_v43 }
 0x18f   :  { %v1457_v50 = vpop.f32.mrf.mxu0 }
 0x190   :  { %v668_v51 = vadd.f32 %v1869_v36, %v591_v47  ;;  %v606_v52 = vadd.f32 %v1457_v50, %v1431_v30  ;;  %1481 = vmatprep.mubr.msk.f32.mxu1 %vm51_vm13, %v682_v46  ;;  %v685_v57 = vmax.f32 %v669_v49, 0.0  ;;  %v1446_v30 = vpop.f32.mrf.mxu1 }
 0x191   :  { %v600_v53 = vpop.f32.mrf.mxu0  ;;  %1482 = vmatmul.mubr.msk.f32.vlgmr.msra.gmra.mxu1 %vm51_vm13, %v683_v48 }
 0x192   :  { %v684_v55 = vmax.f32 %v668_v51, 0.0  ;;  %v601_v56 = vadd.f32 %v600_v53, %v406_v31  ;;  %v671_v58 = vadd.f32 %v1869_v36, %v606_v52  ;;  %v456_v39 = vpop.f32.mrf.mxu1 }
 0x193   :  { %v1460_v59 = vpop.f32.mrf.mxu0 }
 0x194   :  { %v670_v60 = vadd.f32 %v1869_v36, %v601_v56  ;;  %v616_v61 = vadd.f32 %v1460_v59, %v1434_v32  ;;  %1484 = vmatprep.mubr.msk.f32.mxu1 %vm51_vm13, %v684_v55  ;;  %v687_v3 = vmax.f32 %v671_v58, 0.0 }
 0x195   :  { %v610_v62 = vpop.f32.mrf.mxu0  ;;  %1485 = vmatmul.mubr.msk.f32.gmra.mxu1 %vm51_vm13, %v685_v57 }
 0x196   :  { %v686_v0 = vmax.f32 %v670_v60, 0.0  ;;  %v611_v2 = vadd.f32 %v610_v62, %v416_v33  ;;  %v673_v5 = vadd.f32 %v1869_v36, %v616_v61  ;;  %v1305_v61 = vld [vmem:[%s1990_s8] ss:$0 sm:$0xff] }
 0x197   :  { %v1463_v6 = vpop.f32.mrf.mxu0 }
 0x198   :  { %v672_v7 = vadd.f32 %v1869_v36, %v611_v2  ;;  %v626_v8 = vadd.f32 %v1463_v6, %v1437_v38  ;;  %1487 = vmatprep.mubr.msk.f32.mxu1 %vm51_vm13, %v686_v0  ;;  %v689_v13 = vmax.f32 %v673_v5, 0.0 }
 0x199   :  { %v620_v9 = vpop.f32.mrf.mxu0  ;;  %1488 = vmatmul.mubr.msk.f32.gmra.mxu1 %vm51_vm13, %v687_v3 }
 0x19a   :  { %v688_v11 = vmax.f32 %v672_v7, 0.0  ;;  %v621_v12 = vadd.f32 %v620_v9, %v426_v45  ;;  %v675_v14 = vadd.f32 %v1869_v36, %v626_v8 }
 0x19b   :  { %v1466_v15 = vpop.f32.mrf.mxu0 }
 0x19c   :  { %v674_v16 = vadd.f32 %v1869_v36, %v621_v12  ;;  %v636_v17 = vadd.f32 %v1466_v15, %v1440_v54  ;;  %1490 = vmatprep.mubr.msk.f32.mxu1 %vm51_vm13, %v688_v11  ;;  %v691_v24 = vmax.f32 %v675_v14, 0.0 }
 0x19d   :  { %v630_v18 = vpop.f32.mrf.mxu0  ;;  %1491 = vmatmul.mubr.msk.f32.gmra.mxu1 %vm51_vm13, %v689_v13 }
 0x19e   :  { %v690_v20 = vmax.f32 %v674_v16, 0.0  ;;  %v631_v23 = vadd.f32 %v630_v18, %v436_v63  ;;  %v677_v25 = vadd.f32 %v1869_v36, %v636_v17  ;;  %v1578_v18 = vmov 1.0  }
 0x19f   :  { %v1469_v26 = vpop.f32.mrf.mxu0 }
 0x1a0   :  { %v676_v27 = vadd.f32 %v1869_v36, %v631_v23  ;;  %v646_v28 = vadd.f32 %v1469_v26, %v1443_v10  ;;  %1493 = vmatprep.mubr.msk.f32.mxu1 %vm51_vm13, %v690_v20  ;;  %v693_v33 = vmax.f32 %v677_v25, 0.0  ;;  %v1007_v20 = vld [vmem:[%s1991_s10 + $0x10] sm:$0xff]  ;;  %v912_v23 = vld [vmem:[#allocation2] sm:$0xff] }
 0x1a1   :  { %v640_v29 = vpop.f32.mrf.mxu0  ;;  %1494 = vmatmul.mubr.msk.f32.gmra.mxu1 %vm51_vm13, %v691_v24 }
 0x1a2   :  { %v692_v31 = vmax.f32 %v676_v27, 0.0  ;;  %v641_v32 = vadd.f32 %v640_v29, %v446_v19  ;;  %v679_v34 = vadd.f32 %v1869_v36, %v646_v28  ;;  %v1008_v19 = vld [vmem:[%s1991_s10 + $0x18] sm:$0xff]  ;;  %v1001_v27 = vpop.permute.xlu1 %1000 }
 0x1a3   :  { %v1472_v35 = vpop.f32.mrf.mxu0 }
 0x1a4   :  { %v678_v37 = vadd.f32 %v1869_v36, %v641_v32  ;;  %v656_v38 = vadd.f32 %v1472_v35, %v1446_v30  ;;  %1496 = vmatprep.mubr.msk.f32.mxu1 %vm51_vm13, %v692_v31  ;;  %v695_v43 = vmax.f32 %v679_v34, 0.0  ;;  %v1004_v30 = vld [vmem:[%s1992_s9] sm:$0xf]  ;;  %v1167_v31 = vld [vmem:[%s1993_s12 + $0x18] sm:$0xff]  ;;  %v1166_v32 = vld [vmem:[%s1993_s12 + $0x10] sm:$0xff] }
 0x1a5   :  { %v650_v40 = vpop.f32.mrf.mxu0  ;;  %1497 = vmatmul.mubr.msk.f32.gmra.mxu1 %vm51_vm13, %v693_v33  ;;  %v1164_v33 = vld [vmem:[%s1993_s12] sm:$0xff] }
 0x1a6   :  { %v694_v41 = vmax.f32 %v678_v37, 0.0  ;;  %v651_v42 = vadd.f32 %v650_v40, %v456_v39  ;;  %v681_v44 = vadd.f32 %v1869_v36, %v656_v38  ;;  %v1328_v38 = vld [vmem:[%s1994_s11] ss:$0 sm:$0xff] }
 0x1a8   :  { %v680_v45 = vadd.f32 %v1869_v36, %v651_v42  ;;  %1499 = vmatprep.mubr.msk.f32.mxu1 %vm51_vm13, %v694_v41  ;;  %v697_v47 = vmax.f32 %v681_v44, 0.0 }
 0x1a9   :  { %1500 = vmatmul.mubr.msk.f32.gmra.mxu1 %vm51_vm13, %v695_v43  ;;  %v1329_v43 = vld [vmem:[%s1995_s13] ss:$0 sm:$0xff] }
 0x1aa   :  { %v696_v46 = vmax.f32 %v680_v45, 0.0 }
 0x1ac   :  { %1502 = vmatprep.mubr.msk.f32.mxu1 %vm51_vm13, %v696_v46 }
 0x1ad   :  { %1503 = vmatmul.mubr.msk.f32.gmra.mxu1 %vm51_vm13, %v697_v47 }
 0x251   :  { %v1483_v48 = vpop.f32.mrf.mxu1 }
 0x252   :  { %v830_v16 = vadd.f32 %v1483_v48, %v1305_v61 }
 0x253   :  { %v824_v49 = vpop.f32.mrf.mxu1 }
 0x254   :  { %v825_v17 = vadd.f32 %v1305_v61, %v824_v49 }
 0x255   :  { %v1486_v50 = vpop.f32.mrf.mxu1 }
 0x256   :  { %v840_v14 = vadd.f32 %v1486_v50, %v1305_v61 }
 0x257   :  { %v834_v51 = vpop.f32.mrf.mxu1 }
 0x258   :  { %v835_v15 = vadd.f32 %v1305_v61, %v834_v51 }
 0x259   :  { %v1489_v52 = vpop.f32.mrf.mxu1 }
 0x25a   :  { %v850_v12 = vadd.f32 %v1489_v52, %v1305_v61 }
 0x25b   :  { %v844_v53 = vpop.f32.mrf.mxu1 }
 0x25c   :  { %v845_v13 = vadd.f32 %v1305_v61, %v844_v53 }
 0x25d   :  { %v1492_v54 = vpop.f32.mrf.mxu1 }
 0x25e   :  { %v860_v10 = vadd.f32 %v1492_v54, %v1305_v61 }
 0x25f   :  { %v854_v55 = vpop.f32.mrf.mxu1 }
 0x260   :  { %v855_v11 = vadd.f32 %v1305_v61, %v854_v55 }
 0x261   :  { %v1495_v56 = vpop.f32.mrf.mxu1 }
 0x262   :  { %v870_v8 = vadd.f32 %v1495_v56, %v1305_v61 }
 0x263   :  { %v864_v36 = vpop.f32.mrf.mxu1 }
 0x264   :  { %v865_v9 = vadd.f32 %v1305_v61, %v864_v36 }
 0x265   :  { %v1498_v57 = vpop.f32.mrf.mxu1 }
 0x266   :  { %v880_v6 = vadd.f32 %v1498_v57, %v1305_v61 }
 0x267   :  { %v874_v58 = vpop.f32.mrf.mxu1 }
 0x268   :  { %v875_v7 = vadd.f32 %v1305_v61, %v874_v58 }
 0x269   :  { %v1501_v59 = vpop.f32.mrf.mxu1 }
 0x26a   :  { %v890_v3 = vadd.f32 %v1501_v59, %v1305_v61 }
 0x26b   :  { %v884_v60 = vpop.f32.mrf.mxu1 }
 0x26c   :  { %v885_v5 = vadd.f32 %v1305_v61, %v884_v60 }
 0x26d   :  { %v1504_v62 = vpop.f32.mrf.mxu1 }
 0x26e   :  { %v900_v63 = vadd.f32 %v1504_v62, %v1305_v61 }
 0x26f   :  { %v894_v0 = vpop.f32.mrf.mxu1 }
 0x270   :  { %v895_v2 = vadd.f32 %v1305_v61, %v894_v0  ;;  %1506 = vmatpush3.msra.mxu0 %v900_v63 }
 0x271   :  { %1507 = vmatprep.subr.mxu0 %v1576_v1 }
 0x272   :  { %1508 = vmatpush3.msra.mxu0 %v895_v2 }
 0x273   :  { %1509 = vmatprep.subr.mxu0 %v1576_v1 }
 0x274   :  { %1510 = vmatpush3.msra.mxu0 %v890_v3 }
 0x275   :  { %1511 = vmatprep.subr.mxu0 %v1576_v1 }
 0x276   :  { %1512 = vmatpush3.msra.mxu0 %v885_v5 }
 0x277   :  { %1513 = vmatprep.subr.mxu0 %v1576_v1 }
 0x278   :  { %1514 = vmatpush3.msra.mxu0 %v880_v6 }
 0x279   :  { %1515 = vmatprep.subr.mxu0 %v1576_v1 }
 0x27a   :  { %1516 = vmatpush3.msra.mxu0 %v875_v7 }
 0x27b   :  { %1517 = vmatprep.subr.mxu0 %v1576_v1 }
 0x27c   :  { %1518 = vmatpush3.msra.mxu0 %v870_v8 }
 0x27d   :  { %1519 = vmatprep.subr.mxu0 %v1576_v1 }
 0x27e   :  { %1520 = vmatpush3.msra.mxu0 %v865_v9 }
 0x27f   :  { %1521 = vmatprep.subr.mxu0 %v1576_v1 }
 0x280   :  { %1522 = vmatpush3.msra.mxu0 %v860_v10 }
 0x281   :  { %1523 = vmatprep.subr.mxu0 %v1576_v1 }
 0x282   :  { %1524 = vmatpush3.msra.mxu0 %v855_v11 }
 0x283   :  { %1525 = vmatprep.subr.mxu0 %v1576_v1 }
 0x284   :  { %1526 = vmatpush3.msra.mxu0 %v850_v12 }
 0x285   :  { %1527 = vmatprep.subr.mxu0 %v1576_v1 }
 0x286   :  { %1528 = vmatpush3.msra.mxu0 %v845_v13 }
 0x287   :  { %1529 = vmatprep.subr.mxu0 %v1576_v1 }
 0x288   :  { %1530 = vmatpush3.msra.mxu0 %v840_v14 }
 0x289   :  { %1531 = vmatprep.subr.mxu0 %v1576_v1 }
 0x28a   :  { %1532 = vmatpush3.msra.mxu0 %v835_v15 }
 0x28b   :  { %1533 = vmatprep.subr.mxu0 %v1576_v1 }
 0x28c   :  { %1534 = vmatpush3.msra.mxu0 %v830_v16 }
 0x28d   :  { %1535 = vmatprep.subr.mxu0 %v1576_v1 }
 0x28e   :  { %1536 = vmatpush3.msra.mxu0 %v825_v17 }
 0x28f   :  { %1538 = vmatmul.mubr.msk.f32.vlgmr.msra.gmra.mxu0 %vm909_vm3, %v1578_v18  ;;  %1540 = vmatprep.subr.mxu0 %v1576_v1 }
 0x290   :  { %1548 = vmatprep.mubr.msk.f32.mxu0 %vm1577_vm2, %v1576_v1  ;;  %1541 = vmatpush3.msra.mxu0 %v1008_v19 }
 0x291   :  { %1542 = vmatprep.subr.mxu0 %v1576_v1 }
 0x292   :  { %1543 = vmatpush3.msra.mxu0 %v1007_v20 }
 0x293   :  { %1544 = vmatprep.subr.mxu0 %v1576_v1 }
 0x294   :  { %1545 = vmatpush3.msra.mxu0 %v1006_v21 }
 0x295   :  { %1546 = vmatprep.subr.mxu0 %v1576_v1 }
 0x296   :  { %1547 = vmatpush3.msra.mxu0 %v1005_v22 }
 0x297   :  { %1551 = vmatprep.subr.mxu0 %v1576_v1 }
 0x34f   :  { %v979_v24 = vpop.f32.mrf.mxu0 }
 0x350   :  { %v983_v25 = vadd.f32 %v979_v24, %v912_v23 }
 0x351   :  { %v1539_v26 = vpop.f32.mrf.mxu0 }
 0x352   :  { %984 = vst.msk [vmem:[#allocation2] sm:$0xff] %vm51_vm13, %v983_v25 }
 0x359   :  { %v994_v28 = vld [vmem:[#allocation2] sm:$0xff] }
 0x35a   :  { %v1003_v29 = vmul.f32 %v1001_v27, %v994_v28 }
 0x35c   :  { %1549 = vmatmul.mubr.msk.f32.vlgmr.msra.gmra.mxu0 %vm51_vm13, %v1003_v29 }
 0x35d   :  { %1552 = vmatpush3.msk.msra.mxu0 %vm94_vm0, %v1004_v30  ;;  %1553 = vmatprep.mubr.msk.f32.mxu0 %vm1577_vm2, %v1576_v1 }
 0x35e   :  { %1556 = vmatprep.subr.mxu0 %v1576_v1 }
 0x360   :  { %1554 = vmatmul.mubr.msk.f32.vlgmr.msra.gmra.mxu0 %vm90_vm1, %v1664_v4  ;;  %v1165_v4 = vld [vmem:[%s1993_s12 + $0x8] sm:$0xff] }
 0x361   :  { %1564 = vmatprep.mubr.msk.f32.mxu0 %vm1577_vm2, %v1576_v1  ;;  %1557 = vmatpush3.msra.mxu0 %v1167_v31 }
 0x362   :  { %1558 = vmatprep.subr.mxu0 %v1576_v1 }
 0x363   :  { %1559 = vmatpush3.msra.mxu0 %v1166_v32 }
 0x364   :  { %1560 = vmatprep.subr.mxu0 %v1576_v1 }
 0x365   :  { %1561 = vmatpush3.msra.mxu0 %v1165_v4 }
 0x366   :  { %1562 = vmatprep.subr.mxu0 %v1576_v1 }
 0x367   :  { %1563 = vmatpush3.msra.mxu0 %v1164_v33 }
 0x41c   :  { %v1078_v34 = vpop.f32.mrf.mxu0 }
 0x41e   :  { %v1550_v35 = vpop.f32.mrf.mxu0 }
 0x420   :  { %v1151_v37 = vpop.f32.mrf.mxu0 }
 0x421   :  { %v1152_v39 = vadd.f32 %v1151_v37, %v1078_v34 }
 0x422   :  { %v1555_v40 = vpop.f32.mrf.mxu0 }
 0x423   :  { %v1162_v41 = vadd.f32 %v1328_v38, %v1152_v39 }
 0x425   :  { %v1163_v42 = vmax.f32 %v1162_v41, 0.0 }
 0x427   :  { %1565 = vmatmul.mubr.msk.f32.vlgmr.msra.gmra.mxu0 %vm51_vm13, %v1163_v42 }
 0x4e7   :  { %v1244_v44 = vpop.f32.mrf.mxu0 }
 0x4e8   :  { %v1245_v1 = vadd.f32 %v1329_v43, %v1244_v44 }
 0x4e9   :  { %v1566_v45 = vpop.f32.mrf.mxu0 }
 0x4ea   :  { %1248 = vst.msk [vmem:[%s1996_s14] sm:$0xff] %vm90_vm1, %v1245_v1 }

</bundles_post_ra>
